<compile_context>
chip_gen: v5e
topology: v5e:2x2
jax: 0.10.0
libtpu: 0.0.40
codegen_flags: <defaults>
</compile_context>

<pallas_src>
import functools

import jax
import jax.numpy as jnp
from jax import lax
from jax.experimental import pallas as pl
from jax.experimental.pallas import tpu as pltpu


def _label_smooth_kernel(logits_ref, label_ref, out_ref, *,
                         lb_pos, lb_neg, ignore_index, hw_valid):
    j = pl.program_id(1)

    logits = logits_ref[0].astype(jnp.float32)      # (C, T) — cast in-kernel
    label = label_ref[0]                            # (1, T) int32
    C, T = logits.shape

    # Columns beyond the real spatial extent (partial tail block) are treated
    # exactly like ignore_index positions.
    col = j * T + lax.broadcasted_iota(jnp.int32, (1, T), 1)        # (1, T)
    ignore = jnp.logical_or(label == ignore_index, col >= hw_valid)  # (1, T)
    label_safe = jnp.where(ignore, 0, label)                         # (1, T)

    # Fused smoothed-one-hot contraction:
    #   -sum_c(onehot_smooth * logits) with onehot_smooth = lb_neg everywhere
    #   and lb_pos at the label class.
    cls_ids = lax.broadcasted_iota(jnp.int32, (C, T), 0)
    w = jnp.where(cls_ids == label_safe, lb_pos, lb_neg)             # (C, T)
    loss_col = -jnp.sum(w * logits, axis=0, keepdims=True)           # (1, T)

    # Select (not multiply) so garbage/NaN in masked columns cannot leak.
    loss_col = jnp.where(ignore, 0.0, loss_col)
    valid_col = jnp.where(ignore, 0.0, 1.0)

    loss_s = jnp.sum(loss_col)       # per-block partial loss sum
    cnt_s = jnp.sum(valid_col)       # per-block partial valid count

    # Lane-dense (2, 128) partial block: row 0 = loss sum, row 1 = count
    # (broadcast to all lanes; wrapper reads lane 0).
    row = lax.broadcasted_iota(jnp.int32, (2, 128), 0)
    out_ref[...] = jnp.where(row == 0, loss_s, cnt_s).reshape(1, 1, 2, 128)


def label_smooth_softmax(logits, label, lb_smooth=0.1, reduction='mean',
                         ignore_index=-100,
                         target_block_bytes=4 * 1024 * 1024):
    """logits: (N, C, *spatial) float; label: (N, *spatial) int. Scalar loss."""
    assert reduction in ('mean', 'sum')
    # TODO(synk): reduction='none' (per-element loss map) not implemented here.

    N, C = logits.shape[0], logits.shape[1]
    HW = 1
    for d in logits.shape[2:]:
        HW *= d

    # (N, C, spatial...) -> (N, C, HW): contiguous reshape, no HBM transpose.
    logits3d = logits.reshape(N, C, HW)                  # native dtype, no upcast
    label3d = label.reshape(N, 1, HW).astype(jnp.int32)

    # Spatial tile: multiple of 128 lanes, sized to ~target_block_bytes.
    itemsize = jnp.dtype(logits.dtype).itemsize
    t_max = max(128, (target_block_bytes // (C * itemsize)) // 128 * 128)
    hw_pad = pl.cdiv(HW, 128) * 128
    T = min(t_max, hw_pad)
    grid_j = pl.cdiv(HW, T)
    # TODO(synk): for very large C (e.g. NLP vocab), also tile the class axis.

    kernel = functools.partial(
        _label_smooth_kernel,
        lb_pos=float(1.0 - lb_smooth),
        lb_neg=float(lb_smooth) / C,
        ignore_index=int(ignore_index),
        hw_valid=HW,
    )

    partials = pl.pallas_call(
        kernel,
        out_shape=jax.ShapeDtypeStruct((N, grid_j, 2, 128), jnp.float32),
        grid_spec=pltpu.PrefetchScalarGridSpec(
            num_scalar_prefetch=0,
            grid=(N, grid_j),
            in_specs=[
                pl.BlockSpec((1, C, T), lambda n, j: (n, 0, j)),
                pl.BlockSpec((1, 1, T), lambda n, j: (n, 0, j)),
            ],
            out_specs=pl.BlockSpec((1, 1, 2, 128), lambda n, j: (n, j, 0, 0)),
        ),
        compiler_params=pltpu.CompilerParams(
            # Every grid point writes its own partial block -> fully parallel;
            # lets v7x shard the loop across both TensorCores.
            dimension_semantics=("parallel", "parallel"),
            vmem_limit_bytes=32 * 1024 * 1024,
        ),
    )(logits3d, label3d)

    loss_sum = jnp.sum(partials[:, :, 0, 0])
    if reduction == 'sum':
        return loss_sum
    n_valid = jnp.sum(partials[:, :, 1, 0])
    # NOTE: like the PyTorch reference, returns NaN/Inf if *every* label is
    # ignore_index (division by zero valid count).
    return loss_sum / n_valid


def _reference(logits, label, lb_smooth=0.1, reduction='mean', ignore_index=-100):
    logits = logits.astype(jnp.float32)
    C = logits.shape[1]
    ignore = label == ignore_index
    n_valid = jnp.sum(jnp.logical_not(ignore)).astype(jnp.float32)
    label_safe = jnp.where(ignore, 0, label)
    lb_pos, lb_neg = 1.0 - lb_smooth, lb_smooth / C
    onehot = jax.nn.one_hot(label_safe, C, axis=1) * (lb_pos - lb_neg) + lb_neg
    loss = -jnp.sum(logits * onehot, axis=1)
    loss = jnp.where(ignore, 0.0, loss)
    if reduction == 'mean':
        return jnp.sum(loss) / n_valid
    return jnp.sum(loss)


if __name__ == "__main__":
    key = jax.random.PRNGKey(0)
    k1, k2, k3 = jax.random.split(key, 3)

    N, C, H, W = 2, 4, 16, 16
    logits = jax.random.normal(k1, (N, C, H, W), dtype=jnp.float32)
    label = jax.random.randint(k2, (N, H, W), 0, C, dtype=jnp.int32)
    # mark ~10% of positions as ignored
    ignore_mask = jax.random.uniform(k3, (N, H, W)) < 0.1
    label = jnp.where(ignore_mask, -100, label)

    loss = label_smooth_softmax(logits, label, lb_smooth=0.1,
                                reduction='mean', ignore_index=-100)
    loss = jax.block_until_ready(loss)

    ref = _reference(logits, label, lb_smooth=0.1,
                     reduction='mean', ignore_index=-100)
    assert jnp.allclose(loss, ref, atol=1e-5, rtol=1e-5), (loss, ref)

    # also exercise 'sum' reduction
    loss_sum = jax.block_until_ready(
        label_smooth_softmax(logits, label, lb_smooth=0.1,
                             reduction='sum', ignore_index=-100))
    ref_sum = _reference(logits, label, lb_smooth=0.1,
                         reduction='sum', ignore_index=-100)
    assert jnp.allclose(loss_sum, ref_sum, atol=1e-4, rtol=1e-5), (loss_sum, ref_sum)

    print("KERNEL_OK")
</pallas_src>

<mosaic_0001>
module attributes {stable_mosaic.version = 11 : i64} {
  func.func @_label_smooth_kernel(%arg0: i32, %arg1: i32, %arg2: memref<1x4x256xf32, #tpu.memory_space<vmem>>, %arg3: memref<1x1x256xi32, #tpu.memory_space<vmem>>, %arg4: memref<1x1x2x128xf32, #tpu.memory_space<vmem>>) attributes {dimension_semantics = [#tpu.dimension_semantics<parallel>, #tpu.dimension_semantics<parallel>], iteration_bounds = array<i64: 2, 1>, scalar_prefetch = 0 : i64, scratch_operands = 0 : i64, tpu.core_type = #tpu.core_type<tc>, window_params = [{transform_indices = @transform_0, window_bounds = array<i64: 1, 4, 256>}, {transform_indices = @transform_1, window_bounds = array<i64: 1, 1, 256>}, {transform_indices = @transform_2, window_bounds = array<i64: 1, 1, 2, 128>}]} {
    %c0 = arith.constant 0 : index
    %c0_0 = arith.constant 0 : index
    %c0_1 = arith.constant 0 : index
    %0 = vector.load %arg2[%c0, %c0_0, %c0_1] : memref<1x4x256xf32, #tpu.memory_space<vmem>>, vector<1x4x256xf32>
    %1 = vector.shape_cast %0 : vector<1x4x256xf32> to vector<4x256xf32>
    %c0_2 = arith.constant 0 : index
    %c0_3 = arith.constant 0 : index
    %c0_4 = arith.constant 0 : index
    %2 = vector.load %arg3[%c0_2, %c0_3, %c0_4] : memref<1x1x256xi32, #tpu.memory_space<vmem>>, vector<1x1x256xi32>
    %3 = vector.shape_cast %2 : vector<1x1x256xi32> to vector<1x256xi32>
    %c256_i32 = arith.constant 256 : i32
    %4 = arith.muli %arg1, %c256_i32 : i32
    %5 = tpu.iota {dimensions = array<i32: 1>} : vector<1x256xi32>
    %6 = vector.broadcast %4 : i32 to vector<1x256xi32>
    %7 = arith.addi %6, %5 : vector<1x256xi32>
    %c-100_i32 = arith.constant -100 : i32
    %8 = vector.broadcast %c-100_i32 : i32 to vector<1x256xi32>
    %9 = arith.cmpi eq, %3, %8 : vector<1x256xi32>
    %c256_i32_5 = arith.constant 256 : i32
    %10 = vector.broadcast %c256_i32_5 : i32 to vector<1x256xi32>
    %11 = arith.cmpi sge, %7, %10 : vector<1x256xi32>
    %12 = arith.ori %9, %11 : vector<1x256xi1>
    %c0_i32 = arith.constant 0 : i32
    %13 = vector.broadcast %c0_i32 : i32 to vector<1x256xi32>
    %14 = arith.select %12, %13, %3 : vector<1x256xi1>, vector<1x256xi32>
    %15 = tpu.iota {dimensions = array<i32: 0>} : vector<4x256xi32>
    %16 = vector.broadcast %14 : vector<1x256xi32> to vector<4x256xi32>
    %17 = arith.cmpi eq, %15, %16 : vector<4x256xi32>
    %cst = arith.constant 0.899999976 : f32
    %cst_6 = arith.constant 2.500000e-02 : f32
    %18 = vector.broadcast %cst : f32 to vector<4x256xf32>
    %19 = vector.broadcast %cst_6 : f32 to vector<4x256xf32>
    %20 = arith.select %17, %18, %19 : vector<4x256xi1>, vector<4x256xf32>
    %21 = arith.mulf %20, %1 : vector<4x256xf32>
    %cst_7 = arith.constant dense<0.000000e+00> : vector<256xf32>
    %22 = vector.multi_reduction <add>, %21, %cst_7 [0] : vector<4x256xf32> to vector<256xf32>
    %23 = vector.shape_cast %22 : vector<256xf32> to vector<1x256xf32>
    %cst_8 = arith.constant 0.000000e+00 : f32
    %24 = vector.broadcast %cst_8 : f32 to vector<1x256xf32>
    %25 = arith.subf %24, %23 : vector<1x256xf32>
    %cst_9 = arith.constant 0.000000e+00 : f32
    %26 = vector.broadcast %cst_9 : f32 to vector<1x256xf32>
    %27 = arith.select %12, %26, %25 : vector<1x256xi1>, vector<1x256xf32>
    %cst_10 = arith.constant 0.000000e+00 : f32
    %cst_11 = arith.constant 1.000000e+00 : f32
    %28 = vector.broadcast %cst_10 : f32 to vector<1x256xf32>
    %29 = vector.broadcast %cst_11 : f32 to vector<1x256xf32>
    %30 = arith.select %12, %28, %29 : vector<1x256xi1>, vector<1x256xf32>
    %31 = vector.shape_cast %27 : vector<1x256xf32> to vector<1x1x256xf32>
    %cst_12 = arith.constant dense<0.000000e+00> : vector<1xf32>
    %32 = vector.multi_reduction <add>, %31, %cst_12 [1, 2] : vector<1x1x256xf32> to vector<1xf32>
    %33 = vector.shape_cast %32 : vector<1xf32> to vector<1x1x1xf32>
    %34 = vector.extract %33[0, 0, 0] : f32 from vector<1x1x1xf32>
    %35 = vector.shape_cast %30 : vector<1x256xf32> to vector<1x1x256xf32>
    %cst_13 = arith.constant dense<0.000000e+00> : vector<1xf32>
    %36 = vector.multi_reduction <add>, %35, %cst_13 [1, 2] : vector<1x1x256xf32> to vector<1xf32>
    %37 = vector.shape_cast %36 : vector<1xf32> to vector<1x1x1xf32>
    %38 = vector.extract %37[0, 0, 0] : f32 from vector<1x1x1xf32>
    %39 = tpu.iota {dimensions = array<i32: 0>} : vector<2x128xi32>
    %c0_i32_14 = arith.constant 0 : i32
    %40 = vector.broadcast %c0_i32_14 : i32 to vector<2x128xi32>
    %41 = arith.cmpi eq, %39, %40 : vector<2x128xi32>
    %42 = vector.broadcast %34 : f32 to vector<2x128xf32>
    %43 = vector.broadcast %38 : f32 to vector<2x128xf32>
    %44 = arith.select %41, %42, %43 : vector<2x128xi1>, vector<2x128xf32>
    %45 = vector.shape_cast %44 : vector<2x128xf32> to vector<1x1x2x128xf32>
    %c0_15 = arith.constant 0 : index
    %c0_16 = arith.constant 0 : index
    %c0_17 = arith.constant 0 : index
    %c0_18 = arith.constant 0 : index
    %46 = vector.load %arg4[%c0_15, %c0_16, %c0_17, %c0_18] : memref<1x1x2x128xf32, #tpu.memory_space<vmem>>, vector<1x1x2x128xf32>
    tpu.vector_store %arg4[%c0_15, %c0_16, %c0_17, %c0_18], %45 {strides = array<i32>} : memref<1x1x2x128xf32, #tpu.memory_space<vmem>>, vector<1x1x2x128xf32>,
    return
  }
  func.func @transform_0(%arg0: i32, %arg1: i32) -> (i32, i32, i32) {
    %c0_i32 = arith.constant 0 : i32
    %c0_i32_0 = arith.constant 0 : i32
    return %arg0, %c0_i32, %arg1 : i32, i32, i32
  }
  func.func @transform_1(%arg0: i32, %arg1: i32) -> (i32, i32, i32) {
    %c0_i32 = arith.constant 0 : i32
    %c0_i32_0 = arith.constant 0 : i32
    return %arg0, %c0_i32, %arg1 : i32, i32, i32
  }
  func.func @transform_2(%arg0: i32, %arg1: i32) -> (i32, i32, i32, i32) {
    %c0_i32 = arith.constant 0 : i32
    %c0_i32_0 = arith.constant 0 : i32
    %c0_i32_1 = arith.constant 0 : i32
    return %arg0, %arg1, %c0_i32, %c0_i32_0 : i32, i32, i32, i32
  }
}

</mosaic_0001>

<bundles_post_ra>
// kernel: tpu_custom_call.1
= control target key start
LH: loop header
LB: loop body
LE: loop exit
PB: predicated region body
PF: predicated region fallthrough
CT: control target
= control target key end

     0   :  { %7 = vsyncpa [#allocation3], 0  ;;  %s869_s0 = inlined_call_operand.hbm [shape: f32[2,4,256], index: 0, kind: input, shape index: {}]   ;;  %s870_s1 = inlined_call_operand.hbm [shape: s32[2,1,256], index: 1, kind: input, shape index: {}]   ;;  %s871_s2 = inlined_call_operand.hbm [shape: f32[2,1,2,128], index: 2, kind: output, shape index: {}]  }
   0x1   :  { %9 = vsyncpa [#allocation3 + $0x1], 0 }
   0x2   :  { %10 = vsyncpa [#allocation6], 0 }
   0x3   :  { %12 = vsyncpa [#allocation6 + $0x1], 0 }
   0x4   :  { %13 = vsyncpa [#allocation4], 0 }
   0x5   :  { %15 = vsyncpa [#allocation4 + $0x1], 0  ;;  %s706_s9 = smov 0   ;;  %s708_s10 = smov 0  }
   0x6   :  { %s710_s11 = smov 0   ;;  %s712_s12 = smov 0  }
   0x7   :  { %s714_s13 = smov 0   ;;  %s716_s14 = smov 0  }
   0x8 LB: > { %s448_s15 = sadd.s32 4294967295, %s686_s14   ;;  %s449_s16 = sadd.s32 4294967294, %s686_s14   ;;  %s686_s14 = sphi %s716_s14, %s21_s14   ;;  %s682_s13 = sphi %s714_s13, %s883_s13   ;;  %s678_s12 = sphi %s712_s12, %s882_s12   ;;  %s674_s11 = sphi %s710_s11, %s881_s11   ;;  %s670_s10 = sphi %s708_s10, %s880_s10   ;;  %s666_s9 = sphi %s706_s9, %s879_s9  }
   0x9   : > { %s33_s17 = sadd.s32 1, %s682_s13  ;;  %s42_s18 = sadd.s32 1, %s674_s11 }
   0xa   : > { %p35_p0 = scmp.ge.s32.totalorder %s33_s17, 2  ;;  %p49_p1 = scmp.ne.s32.totalorder %s674_s11, %s670_s10 }
   0xb   : > { %p50_p2 = scmp.eq.s32.totalorder %s686_s14, 0  ;;  %p55_p3 = scmp.ne.s32.totalorder %s670_s10, %s666_s9 }
   0xc   : > { %s885_s17 = smov (%p35_p0, %s33_s17), 0  ;;  %p56_p5 = scmp.eq.s32.totalorder %s448_s15, 0 }
   0xd   : > { %p747_p4 = por %p50_p2, %p49_p1  ;;  %s37_s20 = ssub.s32 %s682_s13, %s885_s17 }
   0xe   : > { %p109_p6 = scmp.eq.s32.totalorder %s448_s15, 1  ;;  %p40_p7 = scmp.eq.s32.totalorder %s37_s20, 0 }
   0xf   : > { %p753_p8 = por %p56_p5, %p55_p3  ;;  %p115_p10 = scmp.eq.s32.totalorder %s449_s16, 1 }
  0x10   : > { %p757_p9 = por %p109_p6, %p49_p1  ;;  %p451_p12 = scmp.ge.s32.totalorder %s686_s14, 2 }
  0x11   : > { %s762_s23 = scalar_select %p40_p7, %s674_s11, %s42_s18  }
  0x12   : > { %p764_p11 = por %p115_p10, %p55_p3  ;;  %p487_p13 = scmp.lt.s32.totalorder %s686_s14, 2 }
  0x13   : > { %s135_s25 = sand.u32 1, %s674_s11   ;;  %s465_s27 = sshll.u32 %s682_s13, 3 }
  0x14   : > { %s452_s26 = sshll.u32 %s135_s25, 3  ;;  %s146_s30 = scalar_lea.hbm %s869_s0, %s465_s27 }
  0x15   : > { %s139_s3 = scalar_lea.vmem [#allocation2], %s452_s26  ;;  %s148_s5 = sshll.u32 %s146_s30, 4  ;;  %s149_s5 = int_to_ptr.hbm [resolvable:$true] %s148_s5 }
  0x16   : > { %s150_s4 = sshll.u32 %s139_s3, 4  ;;  %p777_p0 = pnand %p487_p13, %p747_p4  ;;  %s151_s4 = int_to_ptr.vmem [resolvable:$true] %s150_s4 }
  0x17   : > { %p457_p1 = scmp.ge.s32.totalorder %s686_s14, 1  ;;  %p176_p2 = scmp.lt.s32.totalorder %s686_s14, 3 }
  0x18   : > { %s136_s7 = scalar_lea.sflag [#allocation3], %s135_s25  ;;  %s455_s8 = sshll.u32 %s135_s25, 1 }
  0x19   : > { %479 = dma.hbm_to_vmem [thread:$0]  (!%p777_p0), %s149_s5, 128, %s151_s4, %s136_s7  }
  0x1a   : > { %p177_p3 = pnand %p457_p1, %p176_p2  ;;  %s456_s15 = sshll.u32 %s682_s13, 1 }
  0x1b   : > { %s167_s20 = scalar_lea.hbm %s870_s1, %s456_s15  ;;  %s161_s26 = scalar_lea.vmem [#allocation5], %s455_s8 }
  0x1c   : > { %s171_s19 = sshll.u32 %s161_s26, 4  ;;  %s169_s27 = sshll.u32 %s167_s20, 4  ;;  %s172_s19 = int_to_ptr.vmem [resolvable:$true] %s171_s19  ;;  %s170_s27 = int_to_ptr.hbm [resolvable:$true] %s169_s27 }
  0x1d   : > { %s158_s28 = scalar_lea.sflag [#allocation6], %s135_s25  ;;  %180 = sbr.rel (%p177_p3) target bundleno = 266 (0x10a), region = 28 }
  0x1e   : > { %482 = dma.hbm_to_vmem [thread:$0]  (!%p777_p0), %s170_s27, 32, %s172_s19, %s158_s28  }
  0x1f   : > { %s792_s29 = sand.u32 (!%p177_p3), 1, %s670_s10  }
  0x20   : > { %s458_s30 = sshll.u32 (!%p177_p3), %s792_s29, 3  ;;  %s183_s3 = scalar_lea.sflag (!%p177_p3), [#allocation3], %s792_s29 }
  0x21   : > { %s186_s4 = scalar_lea.vmem (!%p177_p3), [#allocation2], %s458_s30 }
  0x22   : > { %653 = dma.done.wait (%p753_p8), %s183_s3, 128  }
  0x23   : > { %655 = vsyncadd (%p753_p8), %s183_s3, 4294967168  ;;  %s459_s25 = sshll.u32 %s792_s29, 1  ;;  %s193_s5 = scalar_lea.sflag [#allocation6], %s792_s29 }
  0x24   : > { %s196_s6 = scalar_lea.vmem [#allocation5], %s459_s25 }
  0x25   : > { %657 = dma.done.wait (%p753_p8), %s193_s5, 32  }
  0x26   : > { %659 = vsyncadd (%p753_p8), %s193_s5, 4294967264  ;;  %vm240_vm0 = vcmask 1040384   ;;  %v688_v0 = vmov 0   ;;  %v245_v3 = vlaneseq  ;;  %v225_v4 = vld [vmem:[%s186_s4] sm:$0xff]  ;;  %v226_v5 = vld [vmem:[%s196_s6] sm:$0x3] }
  0x27   : > { %v239_v1 = vrot.slane %v688_v0, 7  ;;  %254 = vst [vmem:[#allocation1] ss:$2 sm:$0xff] %v225_v4  ;;  %vm234_vm2 = vcmp.eq.s32.totalorder %v226_v5, 4294967196  ;;  %v689_v11 = vmov 0.025  }
  0x28   : > { %v813_v7 = vshrl.u32 %v245_v3, 7  ;;  %vm261_vm6 = vcmask 1043456   ;;  %v690_v37 = vmov 1.0   ;;  %s462_s21 = sshll.u32 %s678_s12, 1  ;;  %s222_s16 = scalar_lea.vmem [#allocation7], %s459_s25 }
  0x29   : > { %v241_v2 = vsel %vm240_vm0, 0, %v239_v1  ;;  %s336_s15 = scalar_lea.hbm %s871_s2, %s462_s21  ;;  %s338_s18 = sshll.u32 %s222_s16, 4  ;;  %s339_s18 = int_to_ptr.vmem [resolvable:$true] %s338_s18 }
  0x2a   : > { %vm242_vm1 = vcmp.ne.s32.totalorder %v241_v2, 0  ;;  %s340_s26 = sshll.u32 %s336_s15, 4  ;;  %vm319_vm7 = vcmp.eq.s32.totalorder %v813_v7, 0  ;;  %s325_s12 = scalar_lea.sflag [#allocation4], %s792_s29  ;;  %s341_s26 = int_to_ptr.hbm [resolvable:$true] %s340_s26 }
  0x2b   : > { %vm809_vm3 = vmor %vm234_vm2, %vm242_vm1  ;;  %s614_s27 = sshra.s32 %s341_s26, 4  ;;  %s620_s4 = scalar_lea.hbm %s871_s2, 4  ;;  %s615_s27 = int_to_ptr.hbm [resolvable:$true] %s614_s27 }
  0x2c   : > { %v244_v8 = vsel %vm809_vm3, 0, %v226_v5  ;;  %v284_v38 = vsel %vm809_vm3, 0.0, %v690_v37  ;;  %s616_s28 = scalar_lea.hbm %s615_s27, 2  ;;  %p621_p7 = scmp.lt.s32.totalorder %s615_s27, %s871_s2 }
  0x2d   : > { %v247_v9 = vperm.slane %v244_v8, 0  ;;  %v248_v10 = vperm.slane %v244_v8, 1  ;;  %v303_v43 = vperm.slane %v284_v38, 0  ;;  %v304_v44 = vperm.slane %v284_v38, 1  ;;  %p617_p4 = scmp.ne.s32.totalorder %s615_s27, %s616_s28  ;;  %p622_p8 = scmp.lt.s32.totalorder %s620_s4, %s616_s28 }
  0x2e   : > { %v255_v14 = vld.sshfl [vmem:[#allocation1] sm:$0xff pattern:$0x75316420]  ;;  %v256_v15 = vld.sshfl [vmem:[#allocation1 + $0x8] sm:$0xff pattern:$0x75316420] }
  0x2f   : > { %vm249_vm4 = vcmp.eq.s32.totalorder %v813_v7, %v247_v9  ;;  %vm250_vm5 = vcmp.eq.s32.totalorder %v813_v7, %v248_v10  ;;  %v307_v46 = vsel %vm240_vm0, %v303_v43, 0.0  ;;  %v308_v47 = vsel %vm240_vm0, %v304_v44, 0.0  ;;  %p618_p5 = pnand %p617_p4, %p757_p9  ;;  %p623_p10 = por %p622_p8, %p621_p7 }
  0x30   : > { %v251_v12 = vsel %vm249_vm4, 0.9, %v689_v11  ;;  %v252_v13 = vsel %vm250_vm5, 0.9, %v689_v11  ;;  %v309_v48 = vadd.f32 %v308_v47, %v307_v46 }
  0x31   : > { %v259_v16 = vmul.f32 %v255_v14, %v251_v12  ;;  %v260_v17 = vmul.f32 %v256_v15, %v252_v13  ;;  %p619_p6 = pneg %p618_p5 }
  0x33   : > { %v262_v18 = vsel %vm261_vm6, %v259_v16, 0.0  ;;  %v269_v19 = vsel %vm261_vm6, %v260_v17, 0.0  ;;  %p624_p13 = pnand %p623_p10, %p619_p6 }
  0x34   : > { %v263_v20 = vrot.slane %v262_v18, 4  ;;  %v270_v21 = vrot.slane %v269_v19, 4 }
  0x36   : > { %v264_v22 = vadd.f32 %v263_v20, %v262_v18  ;;  %v271_v23 = vadd.f32 %v270_v21, %v269_v19 }
  0x38   : > { %v265_v24 = vrot.slane %v264_v22, 2  ;;  %v272_v25 = vrot.slane %v271_v23, 2 }
  0x3a   : > { %v266_v26 = vadd.f32 %v265_v24, %v264_v22  ;;  %v273_v27 = vadd.f32 %v272_v25, %v271_v23 }
  0x3c   : > { %v267_v28 = vrot.slane %v266_v26, 1  ;;  %v274_v29 = vrot.slane %v273_v27, 1 }
  0x3e   : > { %v268_v30 = vadd.f32 %v267_v28, %v266_v26  ;;  %v275_v31 = vadd.f32 %v274_v29, %v273_v27 }
  0x40   : > { %v276_v32 = vsub.f32 0.0, %v268_v30  ;;  %v277_v33 = vsub.f32 0.0, %v275_v31 }
  0x42   : > { %v280_v34 = vrot.slane %v277_v33, 7 }
  0x44   : > { %v281_v35 = vsel %vm240_vm0, %v276_v32, %v280_v34 }
  0x45   : > { %v283_v36 = vsel %vm809_vm3, 0.0, %v281_v35 }
  0x46   : > { %v286_v39 = vperm.slane %v283_v36, 0  ;;  %v287_v40 = vperm.slane %v283_v36, 1 }
  0x48   : > { %v290_v41 = vsel %vm240_vm0, %v286_v39, 0.0  ;;  %v291_v42 = vsel %vm240_vm0, %v287_v40, 0.0 }
  0x49   : > { %v292_v45 = vadd.f32 %v291_v42, %v290_v41 }
  0x4b   : > { %293 = vadd.xlane.f32.xlu0 %v292_v45 }
  0x53   : > { %310 = vadd.xlane.f32.xlu0 %v309_v48 }
  0xbe   : > { %v294_v49 = vpop.xlane.xlu0 %293 }
  0xbf   : > { %v295_v50 = vrot.slane %v294_v49, 4 }
  0xc1   : > { %v296_v51 = vadd.f32 %v295_v50, %v294_v49 }
  0xc3   : > { %v297_v52 = vrot.slane %v296_v51, 2 }
  0xc5   : > { %v298_v53 = vadd.f32 %v297_v52, %v296_v51 }
  0xc6   : > { %v311_v54 = vpop.xlane.xlu0 %310 }
  0xc7   : > { %v312_v55 = vrot.slane %v311_v54, 4  ;;  %v299_v56 = vrot.slane %v298_v53, 1 }
  0xc9   : > { %v313_v57 = vadd.f32 %v312_v55, %v311_v54  ;;  %v300_v58 = vadd.f32 %v299_v56, %v298_v53 }
  0xcb   : > { %v314_v59 = vrot.slane %v313_v57, 2  ;;  %466 = vpush %v300_v58 }
  0xcd   : > { %v315_v60 = vadd.f32 %v314_v59, %v313_v57 }
  0xcf   : > { %v316_v61 = vrot.slane %v315_v60, 1 }
  0xd1   : > { %v317_v62 = vadd.f32 %v316_v61, %v315_v60 }
  0xd3   : > { %468 = vpush %v317_v62 }
  0xfc   : > { %s467_s20 = spop %466 }
  0xfd   : > { %v320_v63 = vstv %s467_s20 }
 0x104   : > { %s469_s19 = spop %468 }
 0x105   : > { %v321_v0 = vstv %s469_s19 }
 0x106   : > { %v322_v1 = vsel %vm319_vm7, %v320_v63, %v321_v0 }
 0x107   : > { %323 = vst [vmem:[%s222_s16] sm:$0x3] %v322_v1 }
 0x108   : > { %627 = shalt.err (!%p624_p13)
}
 0x109   : > { %474 = dma.vmem_to_hbm [thread:$0]  (%p757_p9), %s339_s18, 32, %s341_s26, %s325_s12  }
 0x10a PF: > { %s352_s29 = sand.u32 1, %s666_s9   ;;  %p484_p0 = pnand %p451_p12, %p764_p11 }
 0x10b   : > { %s353_s6 = scalar_lea.sflag [#allocation4], %s352_s29 }
 0x10c   : > { %p485_p1 = pneg %p484_p0 }
 0x10e   : > { %661 = dma.done.wait (%p485_p1), %s353_s6, 32  }
 0x10f   : > { %663 = vsyncadd (%p485_p1), %s353_s6, 4294967264  ;;  %s21_s14 = sadd.s32 1, %s686_s14   ;;  %s879_s9 = smov %s670_s10 }
 0x110   : > { %p18_p2 = scmp.ge.s32.totalorder %s21_s14, 4   ;;  %s880_s10 = smov %s674_s11 }
 0x111   : > { %s881_s11 = smov %s762_s23  ;;  %s882_s12 = smov %s682_s13 }
 0x112   : > { %s883_s13 = smov %s885_s17  ;;  %20 = sbr.rel (!%p18_p2) target bundleno = 8 (0x8), region = 86 }
 0x117   :  { %359 = vsyncpa [#allocation3], 1 }
 0x118   :  { %361 = vsyncpa [#allocation3 + $0x1], 1 }
 0x119   :  { %362 = vsyncpa [#allocation6], 1 }
 0x11a   :  { %364 = vsyncpa [#allocation6 + $0x1], 1 }
 0x11b   :  { %365 = vsyncpa [#allocation4], 1 }
 0x11c   :  { %367 = vsyncpa [#allocation4 + $0x1], 1 }

</bundles_post_ra>
